<compile_context>
chip_gen: v5e
topology: v5e:2x2
jax: 0.10.0
libtpu: 0.0.40
codegen_flags: <defaults>
</compile_context>

<pallas_src>
import functools
import math

import jax
import jax.numpy as jnp
from jax.experimental import pallas as pl
from jax.experimental.pallas import tpu as pltpu


BERT_DIM = 768
N_STACK = 4  # hiddens[9:] of the 13 BERT hidden states -> 4 layers


def bertnn_kernel(h_ref, w1_ref, b1_ref, w2_ref, b2_ref, w3_ref, b3_ref,
                  o_ref, acc_ref, *, inv_ls):
    """Grid = (L, S // TILE_S); both axes are reductions into acc_ref.

    h_ref : (B, TILE_S, 768) bf16  -- one (layer, seq-tile) block of the stack
    w1    : (768, H1),  b1 : (1, H1)
    w2    : (H1, H2),   b2 : (1, H2)
    w3    : (H2, 2),    b3 : (1, 2)
    o_ref : (B, 2) f32
    acc_ref: (B, 768) f32 VMEM scratch (running sum over layers & sequence)
    """
    li = pl.program_id(0)
    si = pl.program_id(1)

    @pl.when(jnp.logical_and(li == 0, si == 0))
    def _init():
        acc_ref[...] = jnp.zeros_like(acc_ref)

    # Fused layer+seq reduction: per-tile partial sum (bf16 stream, f32 accum).
    tile = h_ref[...].astype(jnp.float32)          # (B, TILE_S, D)
    acc_ref[...] += jnp.sum(tile, axis=1)          # (B, D)

    is_last = jnp.logical_and(li == pl.num_programs(0) - 1,
                              si == pl.num_programs(1) - 1)

    @pl.when(is_last)
    def _finalize():
        feats = acc_ref[...] * inv_ls              # mean over layers and seq

        # block1: Linear + ReLU (+ Dropout: identity at inference)
        h1 = jnp.dot(feats, w1_ref[...],
                     preferred_element_type=jnp.float32) + b1_ref[...]
        h1 = jnp.maximum(h1, 0.0)
        # TODO(synk): Dropout(p=0.125) is a no-op in eval-mode forward;
        # training-mode dropout (pltpu.prng_*) is intentionally not applied.

        # block2: Linear + ReLU (+ Dropout identity)
        h2 = jnp.dot(h1, w2_ref[...],
                     preferred_element_type=jnp.float32) + b2_ref[...]
        h2 = jnp.maximum(h2, 0.0)

        # out: Linear + Sigmoid
        logits = jnp.dot(h2, w3_ref[...],
                         preferred_element_type=jnp.float32) + b3_ref[...]
        o_ref[...] = jax.nn.sigmoid(logits).astype(o_ref.dtype)


def _auto_tile_s(S, B, bytes_per_elem=2, budget_bytes=4 * 1024 * 1024):
    """Largest multiple-of-8 seq tile that divides S and fits ~4 MiB/buffer."""
    if S % 8 != 0:
        return S  # must use the full extent when S is not sublane-aligned
    max_rows = max(8, budget_bytes // (B * BERT_DIM * bytes_per_elem))
    t = min(S, (max_rows // 8) * 8)
    while S % t:
        t -= 8
    return max(t, 8)


def bertnn_forward(hidden_stack, params, *, tile_s=None):
    """hidden_stack: (N_STACK, B, S, 768) f32; params: dict of weights/biases."""
    L, B, S, D = hidden_stack.shape
    assert D == BERT_DIM
    w1, b1 = params["w1"], params["b1"]
    w2, b2 = params["w2"], params["b2"]
    w3, b3 = params["w3"], params["b3"]
    H1, H2 = w1.shape[1], w2.shape[1]

    if tile_s is None:
        tile_s = _auto_tile_s(S, B)
    assert S % tile_s == 0, "sequence length must be divisible by tile_s"
    n_s = S // tile_s

    # Stream the big tensor in bf16 (halves HBM bytes); accumulate in f32.
    h_bf16 = hidden_stack.astype(jnp.bfloat16)
    inv_ls = 1.0 / float(L * S)

    # Weights/biases stay VMEM-resident across all reduction steps.
    resident = lambda a: pl.BlockSpec(a.shape, lambda l, s: (0,) * a.ndim)

    cost = pl.CostEstimate(
        flops=L * B * S * D + 2 * B * (D * H1 + H1 * H2 + H2 * 2),
        transcendentals=B * 2,
        bytes_accessed=int(h_bf16.size) * 2
        + sum(int(p.size) * 4 for p in (w1, b1, w2, b2, w3, b3))
        + B * 2 * 4,
    )

    kernel = functools.partial(bertnn_kernel, inv_ls=inv_ls)

    return pl.pallas_call(
        kernel,
        out_shape=jax.ShapeDtypeStruct((B, 2), jnp.float32),
        grid_spec=pltpu.PrefetchScalarGridSpec(
            num_scalar_prefetch=0,
            grid=(L, n_s),
            in_specs=[
                # (layer, seq-tile) blocks of the hidden stack; layer dim squeezed.
                pl.BlockSpec((None, B, tile_s, D), lambda l, s: (l, 0, s, 0)),
                resident(w1), resident(b1),
                resident(w2), resident(b2),
                resident(w3), resident(b3),
            ],
            out_specs=pl.BlockSpec((B, 2), lambda l, s: (0, 0)),
            scratch_shapes=[pltpu.VMEM((B, D), jnp.float32)],
        ),
        compiler_params=pltpu.CompilerParams(
            dimension_semantics=("arbitrary", "arbitrary"),
        ),
        cost_estimate=cost,
    )(h_bf16, w1, b1, w2, b2, w3, b3)


def _linear_init(key, n_in, n_out):
    """Deterministic PyTorch-style nn.Linear init, stored as (in, out)."""
    kw, kb = jax.random.split(key)
    bound = 1.0 / math.sqrt(n_in)
    w = jax.random.uniform(kw, (n_in, n_out), jnp.float32, -bound, bound)
    b = jax.random.uniform(kb, (1, n_out), jnp.float32, -bound, bound)
    return w, b


def make_params(key, n_hidden1, n_hidden2):
    k1, k2, k3 = jax.random.split(key, 3)
    w1, b1 = _linear_init(k1, BERT_DIM, n_hidden1)
    w2, b2 = _linear_init(k2, n_hidden1, n_hidden2)
    w3, b3 = _linear_init(k3, n_hidden2, 2)
    return {"w1": w1, "b1": b1, "w2": w2, "b2": b2, "w3": w3, "b3": b3}


def synthetic_bert_hidden_states(key, ids, mask):
    """Stand-in for BertEmbedding's backbone call.

    # TODO(synk): the pretrained 'bert-base-uncased' transformer itself cannot
    # be reproduced in-script; we deterministically synthesize the last 4
    # hidden-state layers (what `hiddens[9:]` selects) from the PRNG key.
    """
    B, S = ids.shape
    h = jax.random.normal(key, (N_STACK, B, S, BERT_DIM), jnp.float32)
    # zero-out padded positions the way a real encoder roughly would; note the
    # pooled mean still divides by full S, matching PyTorch mean(dim=1).
    h = h * mask[None, :, :, None].astype(jnp.float32)
    return h


if __name__ == "__main__":
    B, S = 2, 16          # small batch / sequence length
    n_hidden1, n_hidden2 = 128, 64

    root = jax.random.PRNGKey(0)
    k_ids, k_hidden, k_params = jax.random.split(root, 3)

    # BertNN.forward inputs: token ids + attention mask
    ids = jax.random.randint(k_ids, (B, S), 0, 30522, dtype=jnp.int32)
    mask = jnp.ones((B, S), dtype=jnp.int32)

    hidden_stack = synthetic_bert_hidden_states(k_hidden, ids, mask)
    params = make_params(k_params, n_hidden1, n_hidden2)

    # tile_s=8 -> grid = (4 layers, 2 seq tiles): exercises init/accumulate/finalize
    out = jax.block_until_ready(bertnn_forward(hidden_stack, params, tile_s=8))

    # sanity: shape (B, 2), values in (0, 1) from sigmoid
    assert out.shape == (B, 2)
    assert bool(jnp.all((out > 0.0) & (out < 1.0)))

    # cross-check against a pure-JAX reference of the same math
    # (reference sees the same bf16-quantized stream the kernel streams)
    h32 = hidden_stack.astype(jnp.bfloat16).astype(jnp.float32)
    feats = jnp.sum(h32, axis=(0, 2)) / float(N_STACK * S)
    h1 = jnp.maximum(feats @ params["w1"] + params["b1"], 0.0)
    h2 = jnp.maximum(h1 @ params["w2"] + params["b2"], 0.0)
    ref = jax.nn.sigmoid(h2 @ params["w3"] + params["b3"])
    assert bool(jnp.allclose(out, ref, atol=1e-4, rtol=1e-4)), (out, ref)

    print("KERNEL_OK")
</pallas_src>

<mosaic_0001>
module attributes {stable_mosaic.version = 11 : i64} {
  func.func @bertnn_kernel(%arg0: i32, %arg1: i32, %arg2: memref<1x2x8x768xbf16, #tpu.memory_space<vmem>>, %arg3: memref<768x128xf32, #tpu.memory_space<vmem>>, %arg4: memref<1x128xf32, #tpu.memory_space<vmem>>, %arg5: memref<128x64xf32, #tpu.memory_space<vmem>>, %arg6: memref<1x64xf32, #tpu.memory_space<vmem>>, %arg7: memref<64x2xf32, #tpu.memory_space<vmem>>, %arg8: memref<1x2xf32, #tpu.memory_space<vmem>>, %arg9: memref<2x2xf32, #tpu.memory_space<vmem>>, %arg10: memref<2x768xf32, #tpu.memory_space<vmem>>) attributes {dimension_semantics = [#tpu.dimension_semantics<arbitrary>, #tpu.dimension_semantics<arbitrary>], iteration_bounds = array<i64: 4, 2>, scalar_prefetch = 0 : i64, scratch_operands = 1 : i64, tpu.core_type = #tpu.core_type<tc>, window_params = [{transform_indices = @transform_0, window_bounds = array<i64: 1, 2, 8, 768>}, {pipeline_mode = #tpu.pipeline_mode<synchronous>, transform_indices = @transform_1, window_bounds = array<i64: 768, 128>}, {pipeline_mode = #tpu.pipeline_mode<synchronous>, transform_indices = @transform_2, window_bounds = array<i64: 1, 128>}, {pipeline_mode = #tpu.pipeline_mode<synchronous>, transform_indices = @transform_3, window_bounds = array<i64: 128, 64>}, {pipeline_mode = #tpu.pipeline_mode<synchronous>, transform_indices = @transform_4, window_bounds = array<i64: 1, 64>}, {pipeline_mode = #tpu.pipeline_mode<synchronous>, transform_indices = @transform_5, window_bounds = array<i64: 64, 2>}, {pipeline_mode = #tpu.pipeline_mode<synchronous>, transform_indices = @transform_6, window_bounds = array<i64: 1, 2>}, {pipeline_mode = #tpu.pipeline_mode<synchronous>, transform_indices = @transform_7, window_bounds = array<i64: 2, 2>}]} {
    %c0_i32 = arith.constant 0 : i32
    %0 = arith.cmpi eq, %arg0, %c0_i32 : i32
    %c0_i32_0 = arith.constant 0 : i32
    %1 = arith.cmpi eq, %arg1, %c0_i32_0 : i32
    %2 = arith.andi %0, %1 : i1
    %3 = arith.extui %2 : i1 to i32
    %c0_i32_1 = arith.constant 0 : i32
    %4 = arith.cmpi ne, %3, %c0_i32_1 : i32
    scf.if %4 {
      %cst_10 = arith.constant 0.000000e+00 : f32
      %17 = vector.broadcast %cst_10 : f32 to vector<2x768xf32>
      %c0_11 = arith.constant 0 : index
      %c0_12 = arith.constant 0 : index
      %18 = vector.load %arg10[%c0_11, %c0_12] : memref<2x768xf32, #tpu.memory_space<vmem>>, vector<2x768xf32>
      tpu.vector_store %arg10[%c0_11, %c0_12], %17 {strides = array<i32>} : memref<2x768xf32, #tpu.memory_space<vmem>>, vector<2x768xf32>,
    } else {
    }
    %c0 = arith.constant 0 : index
    %c0_2 = arith.constant 0 : index
    %c0_3 = arith.constant 0 : index
    %c0_4 = arith.constant 0 : index
    %5 = vector.load %arg2[%c0, %c0_2, %c0_3, %c0_4] : memref<1x2x8x768xbf16, #tpu.memory_space<vmem>>, vector<1x2x8x768xbf16>
    %6 = vector.shape_cast %5 : vector<1x2x8x768xbf16> to vector<2x8x768xbf16>
    %7 = arith.extf %6 : vector<2x8x768xbf16> to vector<2x8x768xf32>
    %c0_5 = arith.constant 0 : index
    %c0_6 = arith.constant 0 : index
    %8 = vector.load %arg10[%c0_5, %c0_6] : memref<2x768xf32, #tpu.memory_space<vmem>>, vector<2x768xf32>
    %cst = arith.constant dense<0.000000e+00> : vector<2x768xf32>
    %9 = vector.multi_reduction <add>, %7, %cst [1] : vector<2x8x768xf32> to vector<2x768xf32>
    %10 = arith.addf %8, %9 : vector<2x768xf32>
    %c0_7 = arith.constant 0 : index
    %c0_8 = arith.constant 0 : index
    %11 = vector.load %arg10[%c0_7, %c0_8] : memref<2x768xf32, #tpu.memory_space<vmem>>, vector<2x768xf32>
    tpu.vector_store %arg10[%c0_7, %c0_8], %10 {strides = array<i32>} : memref<2x768xf32, #tpu.memory_space<vmem>>, vector<2x768xf32>,
    %c3_i32 = arith.constant 3 : i32
    %12 = arith.cmpi eq, %arg0, %c3_i32 : i32
    %c1_i32 = arith.constant 1 : i32
    %13 = arith.cmpi eq, %arg1, %c1_i32 : i32
    %14 = arith.andi %12, %13 : i1
    %15 = arith.extui %14 : i1 to i32
    %c0_i32_9 = arith.constant 0 : i32
    %16 = arith.cmpi ne, %15, %c0_i32_9 : i32
    scf.if %16 {
      %c0_10 = arith.constant 0 : index
      %c0_11 = arith.constant 0 : index
      %17 = vector.load %arg10[%c0_10, %c0_11] : memref<2x768xf32, #tpu.memory_space<vmem>>, vector<2x768xf32>
      %cst_12 = arith.constant 1.562500e-02 : f32
      %18 = vector.broadcast %cst_12 : f32 to vector<2x768xf32>
      %19 = arith.mulf %17, %18 : vector<2x768xf32>
      %c0_13 = arith.constant 0 : index
      %c0_14 = arith.constant 0 : index
      %20 = vector.load %arg3[%c0_13, %c0_14] : memref<768x128xf32, #tpu.memory_space<vmem>>, vector<768x128xf32>
      %cst_15 = arith.constant dense<0.000000e+00> : vector<2x128xf32>
      %21 = tpu.matmul %19, %20, %cst_15 {dimension_numbers = #tpu.dot_dimension_numbers<[1], [0], [0], [1], [0, 0, 1, 1], [], []>} : vector<2x768xf32>, vector<768x128xf32>, vector<2x128xf32> -> vector<2x128xf32>
      %c0_16 = arith.constant 0 : index
      %c0_17 = arith.constant 0 : index
      %22 = vector.load %arg4[%c0_16, %c0_17] : memref<1x128xf32, #tpu.memory_space<vmem>>, vector<1x128xf32>
      %23 = vector.broadcast %22 : vector<1x128xf32> to vector<2x128xf32>
      %24 = arith.addf %21, %23 : vector<2x128xf32>
      %cst_18 = arith.constant 0.000000e+00 : f32
      %25 = vector.broadcast %cst_18 : f32 to vector<2x128xf32>
      %26 = arith.maximumf %24, %25 : vector<2x128xf32>
      %c0_19 = arith.constant 0 : index
      %c0_20 = arith.constant 0 : index
      %27 = vector.load %arg5[%c0_19, %c0_20] : memref<128x64xf32, #tpu.memory_space<vmem>>, vector<128x64xf32>
      %cst_21 = arith.constant dense<0.000000e+00> : vector<2x64xf32>
      %28 = tpu.matmul %26, %27, %cst_21 {dimension_numbers = #tpu.dot_dimension_numbers<[1], [0], [0], [1], [0, 0, 1, 1], [], []>} : vector<2x128xf32>, vector<128x64xf32>, vector<2x64xf32> -> vector<2x64xf32>
      %c0_22 = arith.constant 0 : index
      %c0_23 = arith.constant 0 : index
      %29 = vector.load %arg6[%c0_22, %c0_23] : memref<1x64xf32, #tpu.memory_space<vmem>>, vector<1x64xf32>
      %30 = vector.broadcast %29 : vector<1x64xf32> to vector<2x64xf32>
      %31 = arith.addf %28, %30 : vector<2x64xf32>
      %cst_24 = arith.constant 0.000000e+00 : f32
      %32 = vector.broadcast %cst_24 : f32 to vector<2x64xf32>
      %33 = arith.maximumf %31, %32 : vector<2x64xf32>
      %c0_25 = arith.constant 0 : index
      %c0_26 = arith.constant 0 : index
      %34 = vector.load %arg7[%c0_25, %c0_26] : memref<64x2xf32, #tpu.memory_space<vmem>>, vector<64x2xf32>
      %cst_27 = arith.constant dense<0.000000e+00> : vector<2x2xf32>
      %35 = tpu.matmul %33, %34, %cst_27 {dimension_numbers = #tpu.dot_dimension_numbers<[1], [0], [0], [1], [0, 0, 1, 1], [], []>} : vector<2x64xf32>, vector<64x2xf32>, vector<2x2xf32> -> vector<2x2xf32>
      %c0_28 = arith.constant 0 : index
      %c0_29 = arith.constant 0 : index
      %36 = vector.load %arg8[%c0_28, %c0_29] : memref<1x2xf32, #tpu.memory_space<vmem>>, vector<1x2xf32>
      %37 = vector.broadcast %36 : vector<1x2xf32> to vector<2x2xf32>
      %38 = arith.addf %35, %37 : vector<2x2xf32>
      %39 = arith.negf %38 : vector<2x2xf32>
      %40 = math.exp %39 : vector<2x2xf32>
      %cst_30 = arith.constant 1.000000e+00 : f32
      %41 = vector.broadcast %cst_30 : f32 to vector<2x2xf32>
      %42 = arith.addf %41, %40 : vector<2x2xf32>
      %43 = arith.divf %41, %42 : vector<2x2xf32>
      %c0_31 = arith.constant 0 : index
      %c0_32 = arith.constant 0 : index
      %44 = vector.load %arg9[%c0_31, %c0_32] : memref<2x2xf32, #tpu.memory_space<vmem>>, vector<2x2xf32>
      tpu.vector_store %arg9[%c0_31, %c0_32], %43 {strides = array<i32>} : memref<2x2xf32, #tpu.memory_space<vmem>>, vector<2x2xf32>,
    } else {
    }
    return
  }
  func.func @transform_0(%arg0: i32, %arg1: i32) -> (i32, i32, i32, i32) {
    %c0_i32 = arith.constant 0 : i32
    %c0_i32_0 = arith.constant 0 : i32
    %c0_i32_1 = arith.constant 0 : i32
    return %arg0, %c0_i32, %arg1, %c0_i32_0 : i32, i32, i32, i32
  }
  func.func @transform_1(%arg0: i32, %arg1: i32) -> (i32, i32) {
    %c0_i32 = arith.constant 0 : i32
    %c0_i32_0 = arith.constant 0 : i32
    %c0_i32_1 = arith.constant 0 : i32
    return %c0_i32, %c0_i32_0 : i32, i32
  }
  func.func @transform_2(%arg0: i32, %arg1: i32) -> (i32, i32) {
    %c0_i32 = arith.constant 0 : i32
    %c0_i32_0 = arith.constant 0 : i32
    %c0_i32_1 = arith.constant 0 : i32
    return %c0_i32, %c0_i32_0 : i32, i32
  }
  func.func @transform_3(%arg0: i32, %arg1: i32) -> (i32, i32) {
    %c0_i32 = arith.constant 0 : i32
    %c0_i32_0 = arith.constant 0 : i32
    %c0_i32_1 = arith.constant 0 : i32
    return %c0_i32, %c0_i32_0 : i32, i32
  }
  func.func @transform_4(%arg0: i32, %arg1: i32) -> (i32, i32) {
    %c0_i32 = arith.constant 0 : i32
    %c0_i32_0 = arith.constant 0 : i32
    %c0_i32_1 = arith.constant 0 : i32
    return %c0_i32, %c0_i32_0 : i32, i32
  }
  func.func @transform_5(%arg0: i32, %arg1: i32) -> (i32, i32) {
    %c0_i32 = arith.constant 0 : i32
    %c0_i32_0 = arith.constant 0 : i32
    %c0_i32_1 = arith.constant 0 : i32
    return %c0_i32, %c0_i32_0 : i32, i32
  }
  func.func @transform_6(%arg0: i32, %arg1: i32) -> (i32, i32) {
    %c0_i32 = arith.constant 0 : i32
    %c0_i32_0 = arith.constant 0 : i32
    %c0_i32_1 = arith.constant 0 : i32
    return %c0_i32, %c0_i32_0 : i32, i32
  }
  func.func @transform_7(%arg0: i32, %arg1: i32) -> (i32, i32) {
    %c0_i32 = arith.constant 0 : i32
    %c0_i32_0 = arith.constant 0 : i32
    %c0_i32_1 = arith.constant 0 : i32
    return %c0_i32, %c0_i32_0 : i32, i32
  }
}

</mosaic_0001>

<bundles_post_ra>
// kernel: tpu_custom_call.1
= control target key start
LH: loop header
LB: loop body
LE: loop exit
PB: predicated region body
PF: predicated region fallthrough
CT: control target
= control target key end

     0   :  { %s1467_s0 = inlined_call_operand.hbm [shape: bf16[4,2,16,768], index: 0, kind: input, shape index: {}]   ;;  %s1468_s1 = inlined_call_operand.hbm [shape: f32[768,128], index: 1, kind: input, shape index: {}]   ;;  %s1469_s2 = inlined_call_operand.vmem [shape: f32[1,128], index: 2, kind: input, shape index: {}]   ;;  %s1470_s3 = inlined_call_operand.vmem [shape: f32[128,64], index: 3, kind: input, shape index: {}]   ;;  %s1471_s4 = inlined_call_operand.vmem [shape: f32[1,64], index: 4, kind: input, shape index: {}]   ;;  %s1472_s5 = inlined_call_operand.vmem [shape: f32[64,2], index: 5, kind: input, shape index: {}]   ;;  %s1473_s6 = inlined_call_operand.vmem [shape: f32[1,2], index: 6, kind: input, shape index: {}]   ;;  %s1474_s7 = inlined_call_operand.hbm [shape: f32[2,2], index: 7, kind: output, shape index: {}]  }
   0x1   :  { %1480 = sst [smem:[#allocation16_spill]] %s1468_s1 }
   0x2   :  { %1481 = sst [smem:[#allocation17_spill]] %s1469_s2 }
   0x3   :  { %1482 = sst [smem:[#allocation18_spill]] %s1471_s4 }
   0x4   :  { %1483 = sst [smem:[#allocation19_spill]] %s1473_s6 }
   0x5   :  { %1484 = sst [smem:[#allocation20_spill]] %s1474_s7 }
   0x6   :  { %12 = vsyncpa [#allocation4], 0 }
   0x7   :  { %14 = vsyncpa [#allocation4 + $0x1], 0 }
   0x8   :  { %15 = vsyncpa [#allocation7], 0 }
   0x9   :  { %16 = vsyncpa [#allocation5], 0  ;;  %s1238_s24 = smov 0   ;;  %s1240_s25 = smov 0  }
   0xa   :  { %s1242_s26 = smov 0   ;;  %s1244_s27 = smov 0  }
   0xb   :  { %s1246_s28 = smov 0   ;;  %s1248_s29 = smov 0  }
   0xc   :  { %s1250_s30 = smov 0   ;;  %s1252_s8 = smov 0  }
   0xd LB: > { %1485 = sst [smem:[#allocation12_spill]] %s1180_s29  ;;  %s1475_s9 = sadd.s32 4294967295, %s1188_s8   ;;  %s1188_s8 = sphi %s1252_s8, %s22_s8   ;;  %s1184_s30 = sphi %s1250_s30, %s1508_s30   ;;  %s1180_s29 = sphi %s1248_s29, %s1502_s29   ;;  %s1176_s28 = sphi %s1246_s28, %s1507_s28   ;;  %s1172_s27 = sphi %s1244_s27, %s1501_s27   ;;  %s1168_s26 = sphi %s1242_s26, %s1506_s26   ;;  %s1164_s25 = sphi %s1240_s25, %s1505_s25   ;;  %s1160_s24 = sphi %s1238_s24, %s1504_s24  }
   0xe   : > { %1486 = sst [smem:[#allocation13_spill]] %s1188_s8  ;;  %p56_p0 = scmp.ne.s32.totalorder %s1164_s25, %s1160_s24 }
   0xf   : > { %p1280_p1 = scmp.eq.s32.totalorder %s1475_s9, 0  ;;  %p908_p2 = scmp.ge.s32.totalorder %s1188_s8, 1 }
  0x10   : > { %p214_p3 = scmp.lt.s32.totalorder %s1188_s8, 9  ;;  %s1489_s1 = sld [smem:[#allocation16_spill]] }
  0x11   : > { %p1288_p4 = por %p1280_p1, %p56_p0  ;;  %s1190_s16 = smov [#allocation6]  }
  0x12   : > { %p1295_p5 = pnand %p908_p2, %p214_p3  ;;  %s227_s17 = sshll.u32 %s1190_s16, 4  ;;  %s228_s17 = int_to_ptr.vmem [resolvable:$true] %s227_s17 }
  0x13   : > { %s1191_s18 = smov 128   ;;  %s1192_s19 = smov 8  }
  0x14   : > { %p934_p6 = pneg %p1295_p5  ;;  %s31_s20 = sadd.s32 1, %s1180_s29 }
  0x15   : > { %p32_p8 = scmp.ge.s32.totalorder %s31_s20, 2  ;;  %s34_s21 = sadd.s32 1, %s1184_s30 }
  0x16   : > { %s225_s14 = sshll.u32 %s1489_s1, 4  ;;  %p935_p7 = pnand %p934_p6, %p1280_p1  ;;  %s226_s14 = int_to_ptr.hbm [resolvable:$true] %s225_s14 }
  0x17   : > { %s43_s22 = sadd.s32 1, %s1168_s26  ;;  %p50_p9 = scmp.ne.s32.totalorder %s1168_s26, %s1164_s25 }
  0x18   : > { %937 = dma.hbm_to_vmem [thread:$0]  (!%p935_p7), %s226_s14, 12288, %s228_s17, [#allocation7], %s1191_s18, %s1191_s18, %s1192_s19  }
  0x19   : > { %s1510_s20 = smov (%p32_p8, %s31_s20), 0  ;;  %s1512_s21 = smov (!%p32_p8, %s34_s21), %s1184_s30 }
  0x1a   : > { %1491 = sst [smem:[#allocation14_spill]] %s1510_s20  ;;  %s39_s23 = ssub.s32 %s1180_s29, %s1510_s20 }
  0x1b   : > { %p51_p10 = scmp.eq.s32.totalorder %s1188_s8, 0  ;;  %p36_p11 = scmp.ge.s32.totalorder %s1512_s21, 4 }
  0x1c   : > { %p943_p12 = scmp.lt.s32.totalorder %s1188_s8, 8  ;;  %s256_s24 = sand.u32 1, %s1168_s26  }
  0x1d   : > { %p52_p13 = por %p51_p10, %p50_p9  ;;  %s1514_s21 = smov (%p36_p11, %s1512_s21), 0 }
  0x1e   : > { %1492 = sst [smem:[#allocation15_spill]] %s1514_s21  ;;  %s920_s12 = smul.u32 48, %s256_s24 }
  0x1f   : > { %s38_s13 = ssub.s32 %s1184_s30, %s1514_s21  ;;  %s921_s14 = smul.u32 6, %s1180_s29 }
  0x20   : > { %s40_s16 = sor.u32 %s39_s23, %s38_s13  ;;  %s922_s17 = smul.u32 24, %s1184_s30 }
  0x21   : > { %p41_p0 = scmp.eq.s32.totalorder %s40_s16, 0  ;;  %s260_s18 = scalar_lea.vmem [#allocation3], %s920_s12 }
  0x22   : > { %s270_s19 = sshll.u32 %s260_s18, 4  ;;  %p939_p2 = pnand %p943_p12, %p52_p13  ;;  %s271_s19 = int_to_ptr.vmem [resolvable:$true] %s270_s19 }
  0x23   : > { %s1323_s9 = scalar_select %p41_p0, %s1168_s26, %s43_s22  }
  0x24   : > { %s265_s1 = sadd.s32 %s922_s17, %s921_s14  ;;  %s257_s2 = scalar_lea.sflag [#allocation4], %s256_s24 }
  0x25   : > { %s911_s20 = sshll.u32 %s265_s1, 2  ;;  %s1193_s21 = smov 768  }
  0x26   : > { %s267_s6 = scalar_lea.hbm %s1467_s0, %s911_s20  ;;  %s1194_s29 = smov 384  }
  0x27   : > { %s268_s4 = sshll.u32 %s267_s6, 4  ;;  %s1195_s23 = smov 24   ;;  %s269_s4 = int_to_ptr.hbm [resolvable:$true] %s268_s4 }
  0x28   : > { %941 = dma.hbm_to_vmem [thread:$0]  (!%p939_p2), %s269_s4, 768, %s271_s19, %s257_s2, %s1193_s21, %s1194_s29, %s1195_s23  }
  0x29   : > { %282 = sbr.rel (%p1295_p5) target bundleno = 606 (0x25e), region = 48  ;;  %s284_s22 = sand.u32 (!%p1295_p5), 1, %s1164_s25  }
  0x2a   : > { %s923_s12 = smul.u32 (!%p1295_p5), 48, %s284_s22  ;;  %s285_s13 = scalar_lea.sflag (!%p1295_p5), [#allocation4], %s284_s22 }
  0x2c   : > { %s1331_s1 = scalar_lea.vmem (!%p1295_p5), [#allocation3], %s923_s12 }
  0x2e   : > { %1147 = dma.done.wait (%p1288_p4), %s285_s13, 768  }
  0x2f   : > { %1149 = vsyncadd (%p1288_p4), %s285_s13, 4294966528 }
  0x30   : > { %1151 = dma.done.wait (%p1280_p1), [#allocation7], 12288  }
  0x31   : > { %1153 = vsyncadd (%p1280_p1), [#allocation7], 4294955008  ;;  %p320_p3 = scmp.eq.s32.totalorder %s1176_s28, 0  ;;  %p321_p5 = scmp.eq.s32.totalorder %s1172_s27, 0 }
  0x33   : > { %p322_p6 = pnand %p321_p5, %p320_p3 }
  0x35   : > { %325 = sbr.rel (%p322_p6) target bundleno = 61 (0x3d), region = 60 }
  0x3a   : > { %v1196_v0 = vmov 0.0  }
  0x3b   : > { %326 = vst [vmem:[#allocation2] sm:$0xff] %v1196_v0 }
  0x3c   : > { %327 = vst [vmem:[#allocation2 + $0x8] sm:$0xf] %v1196_v0 }
  0x3d PF: > { %v328_v1 = vld [vmem:[%s1331_s1] sm:$0xff]  ;;  %v329_v2 = vld [vmem:[%s1331_s1 + $0x8] sm:$0xff]  ;;  %v330_v3 = vld [vmem:[%s1331_s1 + $0x10] sm:$0xff]  ;;  %p477_p1 = scmp.eq.s32.totalorder %s1176_s28, 3  ;;  %p478_p4 = scmp.eq.s32.totalorder %s1172_s27, 1  ;;  %vm440_vm0 = vcmask 1041408  }
  0x3e   : > { %v331_v4 = vld [vmem:[%s1331_s1 + $0x18] sm:$0xff]  ;;  %v334_v5 = vunpack.c.l.bf16 %v328_v1  ;;  %v335_v6 = vunpack.c.h.bf16 %v328_v1  ;;  %v336_v7 = vunpack.c.l.bf16 %v329_v2  ;;  %v337_v8 = vunpack.c.h.bf16 %v329_v2  ;;  %v332_v32 = vld [vmem:[%s1331_s1 + $0x20] sm:$0xff]  ;;  %v333_v33 = vld [vmem:[%s1331_s1 + $0x28] sm:$0xff] }
  0x3f   : > { %v338_v9 = vunpack.c.l.bf16 %v330_v3  ;;  %v339_v10 = vunpack.c.h.bf16 %v330_v3  ;;  %v340_v11 = vunpack.c.l.bf16 %v331_v4  ;;  %v341_v12 = vunpack.c.h.bf16 %v331_v4  ;;  %p1349_p7 = pnand %p478_p4, %p477_p1 }
  0x40   : > { %v348_v13 = vrot.slane %v334_v5, 4  ;;  %v354_v14 = vrot.slane %v335_v6, 4  ;;  %v360_v15 = vrot.slane %v336_v7, 4  ;;  %v366_v16 = vrot.slane %v337_v8, 4  ;;  %s1494_s23 = sld [smem:[#allocation17_spill]] (!%p1349_p7) }
  0x41   : > { %v372_v17 = vrot.slane %v338_v9, 4  ;;  %v378_v18 = vrot.slane %v339_v10, 4  ;;  %v384_v19 = vrot.slane %v340_v11, 4  ;;  %v390_v20 = vrot.slane %v341_v12, 4  ;;  %s1495_s29 = sld [smem:[#allocation18_spill]] (!%p1349_p7) }
  0x42   : > { %v349_v21 = vadd.f32 %v348_v13, %v334_v5  ;;  %v355_v22 = vadd.f32 %v354_v14, %v335_v6  ;;  %v361_v23 = vadd.f32 %v360_v15, %v336_v7  ;;  %v367_v24 = vadd.f32 %v366_v16, %v337_v8  ;;  %s1496_s11 = sld [smem:[#allocation19_spill]] (!%p1349_p7) }
  0x43   : > { %v379_v25 = vadd.f32 %v378_v18, %v339_v10  ;;  %v385_v26 = vadd.f32 %v384_v19, %v340_v11  ;;  %v391_v27 = vadd.f32 %v390_v20, %v341_v12  ;;  %v373_v31 = vadd.f32 %v372_v17, %v338_v9 }
  0x44   : > { %v356_v28 = vrot.slane %v355_v22, 2  ;;  %v362_v29 = vrot.slane %v361_v23, 2  ;;  %v368_v30 = vrot.slane %v367_v24, 2  ;;  %v350_v34 = vrot.slane %v349_v21, 2 }
  0x45   : > { %v380_v35 = vrot.slane %v379_v25, 2  ;;  %v386_v36 = vrot.slane %v385_v26, 2  ;;  %v392_v37 = vrot.slane %v391_v27, 2  ;;  %v342_v42 = vunpack.c.l.bf16 %v332_v32 }
  0x46   : > { %v357_v38 = vadd.f32 %v356_v28, %v355_v22  ;;  %v363_v39 = vadd.f32 %v362_v29, %v361_v23  ;;  %v369_v40 = vadd.f32 %v368_v30, %v367_v24  ;;  %v343_v43 = vunpack.c.h.bf16 %v332_v32 }
  0x47   : > { %v393_v41 = vadd.f32 %v392_v37, %v391_v27  ;;  %v344_v44 = vunpack.c.l.bf16 %v333_v33  ;;  %v345_v45 = vunpack.c.h.bf16 %v333_v33  ;;  %v351_v46 = vadd.f32 %v350_v34, %v349_v21 }
  0x48   : > { %v374_v47 = vrot.slane %v373_v31, 2  ;;  %v381_v48 = vadd.f32 %v380_v35, %v379_v25  ;;  %v387_v49 = vadd.f32 %v386_v36, %v385_v26  ;;  %v358_v50 = vrot.slane %v357_v38, 1 }
  0x49   : > { %v364_v51 = vrot.slane %v363_v39, 1  ;;  %v370_v52 = vrot.slane %v369_v40, 1  ;;  %v394_v53 = vrot.slane %v393_v41, 1  ;;  %v396_v54 = vrot.slane %v342_v42, 4 }
  0x4a   : > { %v402_v55 = vrot.slane %v343_v43, 4  ;;  %v408_v56 = vrot.slane %v344_v44, 4  ;;  %v414_v57 = vrot.slane %v345_v45, 4  ;;  %v352_v58 = vrot.slane %v351_v46, 1 }
  0x4b   : > { %v375_v59 = vadd.f32 %v374_v47, %v373_v31  ;;  %v382_v60 = vrot.slane %v381_v48, 1  ;;  %v388_v61 = vrot.slane %v387_v49, 1  ;;  %v397_v62 = vadd.f32 %v396_v54, %v342_v42 }
  0x4c   : > { %v403_v63 = vadd.f32 %v402_v55, %v343_v43  ;;  %v409_v0 = vadd.f32 %v408_v56, %v344_v44  ;;  %v415_v1 = vadd.f32 %v414_v57, %v345_v45  ;;  %v359_v2 = vadd.f32 %v358_v50, %v357_v38 }
  0x4d   : > { %v365_v3 = vadd.f32 %v364_v51, %v363_v39  ;;  %v371_v4 = vadd.f32 %v370_v52, %v369_v40  ;;  %v395_v5 = vadd.f32 %v394_v53, %v393_v41  ;;  %v398_v6 = vrot.slane %v397_v62, 2 }
  0x4e   : > { %v404_v7 = vrot.slane %v403_v63, 2  ;;  %v410_v8 = vrot.slane %v409_v0, 2  ;;  %v416_v9 = vrot.slane %v415_v1, 2  ;;  %v353_v10 = vadd.f32 %v352_v58, %v351_v46  ;;  %v347_v46 = vld [vmem:[#allocation2 + $0x8] sm:$0xf] }
  0x4f   : > { %v376_v11 = vrot.slane %v375_v59, 1  ;;  %v383_v12 = vadd.f32 %v382_v60, %v381_v48  ;;  %v389_v13 = vadd.f32 %v388_v61, %v387_v49  ;;  %v399_v14 = vadd.f32 %v398_v6, %v397_v62  ;;  %v346_v49 = vld [vmem:[#allocation2] sm:$0xff] }
  0x50   : > { %v405_v15 = vadd.f32 %v404_v7, %v403_v63  ;;  %v411_v16 = vadd.f32 %v410_v8, %v409_v0  ;;  %v417_v17 = vadd.f32 %v416_v9, %v415_v1  ;;  %v432_v18 = vrot.slane %v359_v2, 6 }
  0x51   : > { %v433_v19 = vrot.slane %v365_v3, 4  ;;  %v434_v20 = vrot.slane %v371_v4, 2  ;;  %v436_v21 = vrot.slane %v395_v5, 6  ;;  %v400_v22 = vrot.slane %v399_v14, 1 }
  0x52   : > { %v406_v23 = vrot.slane %v405_v15, 1  ;;  %v412_v24 = vrot.slane %v411_v16, 1  ;;  %v418_v25 = vrot.slane %v417_v17, 1  ;;  %v377_v26 = vadd.f32 %v376_v11, %v375_v59 }
  0x53   : > { %v435_v27 = vrot.slane %v383_v12, 6  ;;  %vm442_vm1 = vcmask 1045508   ;;  %v401_v28 = vadd.f32 %v400_v22, %v399_v14  ;;  %v441_v32 = vsel %vm440_vm0, %v353_v10, %v432_v18 }
  0x54   : > { %v407_v29 = vadd.f32 %v406_v23, %v405_v15  ;;  %v413_v30 = vadd.f32 %v412_v24, %v411_v16  ;;  %v419_v31 = vadd.f32 %v418_v25, %v417_v17  ;;  %v443_v33 = vsel %vm442_vm1, %v433_v19, %v434_v20 }
  0x55   : > { %vm444_vm2 = vcmask 1043456   ;;  %v437_v34 = vrot.slane %v401_v28, 4  ;;  %v447_v37 = vsel %vm440_vm0, %v389_v13, %v436_v21  ;;  %v446_v38 = vsel %vm440_vm0, %v377_v26, %v435_v27 }
  0x56   : > { %v438_v35 = vrot.slane %v407_v29, 2  ;;  %v439_v36 = vrot.slane %v419_v31, 6  ;;  %vm456_vm3 = vcmask 1041409   ;;  %v445_v41 = vsel %vm444_vm2, %v441_v32, %v443_v33 }
  0x57   : > { %vm458_vm4 = vcmask 1043459   ;;  %vm460_vm5 = vcmask 1045509   ;;  %vm462_vm6 = vcmask 1047559  }
  0x58   : > { %v448_v39 = vsel %vm442_vm1, %v437_v34, %v438_v35  ;;  %v450_v40 = vsel %vm440_vm0, %v413_v30, %v439_v36 }
  0x59   : > { %v449_v42 = vsel %vm444_vm2, %v447_v37, %v448_v39  ;;  %v466_v43 = vrot.slane %v450_v40, 7 }
  0x5a   : > { %v455_v44 = vrot.slane %v449_v42, 7 }
  0x5b   : > { %v467_v45 = vsel %vm456_vm3, %v466_v43, %v446_v38 }
  0x5c   : > { %v457_v47 = vsel %vm456_vm3, %v455_v44, %v445_v41  ;;  %v468_v48 = vsel %vm458_vm4, %v466_v43, %v467_v45 }
  0x5d   : > { %v459_v50 = vsel %vm458_vm4, %v455_v44, %v457_v47  ;;  %v469_v51 = vsel %vm460_vm5, %v466_v43, %v468_v48 }
  0x5e   : > { %v461_v52 = vsel %vm460_vm5, %v455_v44, %v459_v50  ;;  %v470_v53 = vsel %vm462_vm6, %v466_v43, %v469_v51  ;;  %482 = sbr.rel (%p1349_p7) target bundleno = 594 (0x252), region = 64 }
  0x5f   : > { %v463_v54 = vsel %vm462_vm6, %v455_v44, %v461_v52  ;;  %v474_v55 = vadd.f32 %v470_v53, %v347_v46 }
  0x60   : > { %v473_v56 = vadd.f32 %v463_v54, %v346_v49 }
  0x61   : > { %476 = vst [vmem:[#allocation2 + $0x8] sm:$0xf] %v474_v55 }
  0x62   : > { %475 = vst [vmem:[#allocation2] sm:$0xff] %v473_v56 }
  0x63   : > { %v502_v57 = vld [vmem:[#allocation6 + $0x78] sm:$0xff]  ;;  %v501_v58 = vld [vmem:[#allocation6 + $0x70] sm:$0xff]  ;;  %v500_v61 = vld [vmem:[#allocation6 + $0x68] sm:$0xff]  ;;  %vm778_vm7 = vcmask 523264   ;;  %vm821_vm11 = vcmask 9216  }
  0x64   : > { %v518_v59 = vld [vmem:[#allocation6 + $0xf8] sm:$0xff]  ;;  %604 = vmatpush.msra.mxu0 %v502_v57  ;;  %v517_v60 = vld [vmem:[#allocation6 + $0xf0] sm:$0xff]  ;;  %v516_v62 = vld [vmem:[#allocation6 + $0xe8] sm:$0xff] }
  0x65   : > { %624 = vmatpush.msra.mxu1 %v518_v59  ;;  %v499_v63 = vld [vmem:[#allocation6 + $0x60] sm:$0xff]  ;;  %v498_v1 = vld [vmem:[#allocation6 + $0x58] sm:$0xff]  ;;  %v497_v3 = vld [vmem:[#allocation6 + $0x50] sm:$0xff] }
  0x66   : > { %605 = vmatpush.msra.mxu0 %v501_v58  ;;  %v515_v0 = vld [vmem:[#allocation6 + $0xe0] sm:$0xff]  ;;  %v514_v2 = vld [vmem:[#allocation6 + $0xd8] sm:$0xff]  ;;  %v513_v5 = vld [vmem:[#allocation6 + $0xd0] sm:$0xff] }
  0x67   : > { %625 = vmatpush.msra.mxu1 %v517_v60  ;;  %v534_v4 = vld [vmem:[#allocation6 + $0x178] sm:$0xff]  ;;  %v533_v6 = vld [vmem:[#allocation6 + $0x170] sm:$0xff]  ;;  %v532_v8 = vld [vmem:[#allocation6 + $0x168] sm:$0xff] }
  0x68   : > { %606 = vmatpush.msra.mxu0 %v500_v61  ;;  %644 = vmatpush.msra.mxu2 %v534_v4  ;;  %v550_v7 = vld [vmem:[#allocation6 + $0x1f8] sm:$0xff]  ;;  %v549_v9 = vld [vmem:[#allocation6 + $0x1f0] sm:$0xff]  ;;  %v496_v10 = vld [vmem:[#allocation6 + $0x48] sm:$0xff] }
  0x69   : > { %626 = vmatpush.msra.mxu1 %v516_v62  ;;  %v512_v11 = vld [vmem:[#allocation6 + $0xc8] sm:$0xff]  ;;  %664 = vmatpush.msra.mxu3 %v550_v7  ;;  %v531_v12 = vld [vmem:[#allocation6 + $0x160] sm:$0xff]  ;;  %v530_v16 = vld [vmem:[#allocation6 + $0x158] sm:$0xff] }
  0x6a   : > { %607 = vmatpush.msra.mxu0 %v499_v63  ;;  %645 = vmatpush.msra.mxu2 %v533_v6  ;;  %v548_v13 = vld [vmem:[#allocation6 + $0x1e8] sm:$0xff]  ;;  %v495_v14 = vld [vmem:[#allocation6 + $0x40] sm:$0xff]  ;;  %v494_v18 = vld [vmem:[#allocation6 + $0x38] sm:$0xff] }
  0x6b   : > { %627 = vmatpush.msra.mxu1 %v515_v0  ;;  %v511_v15 = vld [vmem:[#allocation6 + $0xc0] sm:$0xff]  ;;  %665 = vmatpush.msra.mxu3 %v549_v9  ;;  %v510_v19 = vld [vmem:[#allocation6 + $0xb8] sm:$0xff]  ;;  %v529_v20 = vld [vmem:[#allocation6 + $0x150] sm:$0xff] }
  0x6c   : > { %608 = vmatpush.msra.mxu0 %v498_v1  ;;  %646 = vmatpush.msra.mxu2 %v532_v8  ;;  %v547_v17 = vld [vmem:[#allocation6 + $0x1e0] sm:$0xff]  ;;  %v546_v21 = vld [vmem:[#allocation6 + $0x1d8] sm:$0xff]  ;;  %v493_v22 = vld [vmem:[#allocation6 + $0x30] sm:$0xff] }
  0x6d   : > { %628 = vmatpush.msra.mxu1 %v514_v2  ;;  %666 = vmatpush.msra.mxu3 %v548_v13  ;;  %v509_v23 = vld [vmem:[#allocation6 + $0xb0] sm:$0xff]  ;;  %v528_v24 = vld [vmem:[#allocation6 + $0x148] sm:$0xff]  ;;  %v527_v28 = vld [vmem:[#allocation6 + $0x140] sm:$0xff] }
  0x6e   : > { %609 = vmatpush.msra.mxu0 %v497_v3  ;;  %647 = vmatpush.msra.mxu2 %v531_v12  ;;  %v545_v25 = vld [vmem:[#allocation6 + $0x1d0] sm:$0xff]  ;;  %v492_v26 = vld [vmem:[#allocation6 + $0x28] sm:$0xff]  ;;  %v491_v30 = vld [vmem:[#allocation6 + $0x20] sm:$0xff] }
  0x6f   : > { %629 = vmatpush.msra.mxu1 %v513_v5  ;;  %667 = vmatpush.msra.mxu3 %v547_v17  ;;  %v508_v27 = vld [vmem:[#allocation6 + $0xa8] sm:$0xff]  ;;  %v507_v31 = vld [vmem:[#allocation6 + $0xa0] sm:$0xff]  ;;  %v526_v32 = vld [vmem:[#allocation6 + $0x138] sm:$0xff] }
  0x70   : > { %610 = vmatpush.msra.mxu0 %v496_v10  ;;  %648 = vmatpush.msra.mxu2 %v530_v16  ;;  %v544_v29 = vld [vmem:[#allocation6 + $0x1c8] sm:$0xff]  ;;  %v543_v33 = vld [vmem:[#allocation6 + $0x1c0] sm:$0xff]  ;;  %v490_v34 = vld [vmem:[#allocation6 + $0x18] sm:$0xff] }
  0x71   : > { %630 = vmatpush.msra.mxu1 %v512_v11  ;;  %668 = vmatpush.msra.mxu3 %v546_v21  ;;  %v506_v35 = vld [vmem:[#allocation6 + $0x98] sm:$0xff]  ;;  %v525_v36 = vld [vmem:[#allocation6 + $0x130] sm:$0xff]  ;;  %v524_v40 = vld [vmem:[#allocation6 + $0x128] sm:$0xff] }
  0x72   : > { %611 = vmatpush.msra.mxu0 %v495_v14  ;;  %649 = vmatpush.msra.mxu2 %v529_v20  ;;  %v542_v37 = vld [vmem:[#allocation6 + $0x1b8] sm:$0xff]  ;;  %v489_v38 = vld [vmem:[#allocation6 + $0x10] sm:$0xff]  ;;  %v488_v42 = vld [vmem:[#allocation6 + $0x8] sm:$0xff] }
  0x73   : > { %631 = vmatpush.msra.mxu1 %v511_v15  ;;  %669 = vmatpush.msra.mxu3 %v545_v25  ;;  %v505_v39 = vld [vmem:[#allocation6 + $0x90] sm:$0xff]  ;;  %v504_v43 = vld [vmem:[#allocation6 + $0x88] sm:$0xff]  ;;  %v523_v44 = vld [vmem:[#allocation6 + $0x120] sm:$0xff] }
  0x74   : > { %612 = vmatpush.msra.mxu0 %v494_v18  ;;  %650 = vmatpush.msra.mxu2 %v528_v24  ;;  %v541_v41 = vld [vmem:[#allocation6 + $0x1b0] sm:$0xff]  ;;  %v540_v45 = vld [vmem:[#allocation6 + $0x1a8] sm:$0xff]  ;;  %v487_v46 = vld [vmem:[#allocation6] sm:$0xff] }
  0x75   : > { %632 = vmatpush.msra.mxu1 %v510_v19  ;;  %670 = vmatpush.msra.mxu3 %v544_v29  ;;  %v503_v47 = vld [vmem:[#allocation6 + $0x80] sm:$0xff]  ;;  %v483_v48 = vld [vmem:[#allocation2] sm:$0xff]  ;;  %v484_v58 = vld [vmem:[#allocation2 + $0x8] sm:$0xf] }
  0x76   : > { %613 = vmatpush.msra.mxu0 %v493_v22  ;;  %651 = vmatpush.msra.mxu2 %v527_v28  ;;  %v566_v49 = vld [vmem:[#allocation6 + $0x278] sm:$0xff]  ;;  %v485_v51 = vmul.f32 0.015625, %v483_v48  ;;  %v539_v53 = vld [vmem:[#allocation6 + $0x1a0] sm:$0xff]  ;;  %v565_v54 = vld [vmem:[#allocation6 + $0x270] sm:$0xff]  ;;  %v486_v61 = vmul.f32 0.015625, %v484_v58 }
  0x77   : > { %633 = vmatpush.msra.mxu1 %v509_v23  ;;  %671 = vmatpush.msra.mxu3 %v543_v33  ;;  %v582_v50 = vld [vmem:[#allocation6 + $0x2f8] sm:$0xff]  ;;  %v581_v55 = vld [vmem:[#allocation6 + $0x2f0] sm:$0xff]  ;;  %v564_v59 = vld [vmem:[#allocation6 + $0x268] sm:$0xff] }
  0x78   : > { %614 = vmatpush.msra.mxu0 %v492_v26  ;;  %652 = vmatpush.msra.mxu2 %v526_v32  ;;  %v522_v52 = vld [vmem:[#allocation6 + $0x118] sm:$0xff]  ;;  %589 = vst [vmem:[#allocation1] ss:$4 sm:$0xff] %v485_v51  ;;  %v521_v56 = vld [vmem:[#allocation6 + $0x110] sm:$0xff]  ;;  %v580_v60 = vld [vmem:[#allocation6 + $0x2e8] sm:$0xff] }
  0x79   : > { %634 = vmatpush.msra.mxu1 %v508_v27  ;;  %672 = vmatpush.msra.mxu3 %v542_v37  ;;  %v538_v57 = vld [vmem:[#allocation6 + $0x198] sm:$0xff]  ;;  %v563_v62 = vld [vmem:[#allocation6 + $0x260] sm:$0xff]  ;;  %v520_v63 = vld [vmem:[#allocation6 + $0x108] sm:$0xff]  ;;  %591 = vst [vmem:[#allocation1 + $0x20] ss:$4 sm:$0xff] %v486_v61 }
  0x7a   : > { %615 = vmatpush.msra.mxu0 %v491_v30  ;;  %653 = vmatpush.msra.mxu2 %v525_v36  ;;  %v537_v0 = vld [vmem:[#allocation6 + $0x190] sm:$0xff]  ;;  %v579_v1 = vld [vmem:[#allocation6 + $0x2e0] sm:$0xff]  ;;  %v536_v3 = vld [vmem:[#allocation6 + $0x188] sm:$0xff] }
  0x7b   : > { %635 = vmatpush.msra.mxu1 %v507_v31  ;;  %673 = vmatpush.msra.mxu3 %v541_v41  ;;  %v519_v2 = vld [vmem:[#allocation6 + $0x100] sm:$0xff]  ;;  %v562_v4 = vld [vmem:[#allocation6 + $0x258] sm:$0xff]  ;;  %v561_v8 = vld [vmem:[#allocation6 + $0x250] sm:$0xff] }
  0x7c   : > { %616 = vmatpush.msra.mxu0 %v490_v34  ;;  %654 = vmatpush.msra.mxu2 %v524_v40  ;;  %v578_v5 = vld [vmem:[#allocation6 + $0x2d8] sm:$0xff]  ;;  %v535_v7 = vld [vmem:[#allocation6 + $0x180] sm:$0xff]  ;;  %v577_v9 = vld [vmem:[#allocation6 + $0x2d0] sm:$0xff] }
  0x7d   : > { %636 = vmatpush.msra.mxu1 %v506_v35  ;;  %674 = vmatpush.msra.mxu3 %v540_v45  ;;  %v560_v12 = vld [vmem:[#allocation6 + $0x248] sm:$0xff]  ;;  %v559_v16 = vld [vmem:[#allocation6 + $0x240] sm:$0xff]  ;;  %v558_v19 = vld [vmem:[#allocation6 + $0x238] sm:$0xff] }
  0x7e   : > { %617 = vmatpush.msra.mxu0 %v489_v38  ;;  %655 = vmatpush.msra.mxu2 %v523_v44  ;;  %v576_v13 = vld [vmem:[#allocation6 + $0x2c8] sm:$0xff]  ;;  %v575_v17 = vld [vmem:[#allocation6 + $0x2c0] sm:$0xff]  ;;  %v574_v20 = vld [vmem:[#allocation6 + $0x2b8] sm:$0xff] }
  0x7f   : > { %637 = vmatpush.msra.mxu1 %v505_v39  ;;  %675 = vmatpush.msra.mxu3 %v539_v53  ;;  %v594_v6 = vld.sshfl [vmem:[#allocation1 + $0x10] sm:$0xff pattern:$0x73625140]  ;;  %v592_v10 = vld.sshfl [vmem:[#allocation1] sm:$0xff pattern:$0x73625140] }
  0x80   : > { %618 = vmatpush.msra.mxu0 %v488_v42  ;;  %656 = vmatpush.msra.mxu2 %v522_v52  ;;  %v595_v11 = vld.sshfl [vmem:[#allocation1 + $0x18] sm:$0xff pattern:$0x73625140]  ;;  %v593_v14 = vld.sshfl [vmem:[#allocation1 + $0x8] sm:$0xff pattern:$0x73625140] }
  0x81   : > { %638 = vmatpush.msra.mxu1 %v504_v43  ;;  %676 = vmatpush.msra.mxu3 %v538_v57  ;;  %v740_v15 = vld [vmem:[%s1470_s3 + $0x78] sm:$0xff]  ;;  %v739_v18 = vld [vmem:[%s1470_s3 + $0x70] sm:$0xff]  ;;  %v738_v21 = vld [vmem:[%s1470_s3 + $0x68] sm:$0xff] }
  0x82   : > { %619 = vmatpush.msra.mxu0 %v487_v46  ;;  %657 = vmatpush.msra.mxu2 %v521_v56  ;;  %v557_v22 = vld [vmem:[#allocation6 + $0x230] sm:$0xff]  ;;  %v556_v25 = vld [vmem:[#allocation6 + $0x228] sm:$0xff]  ;;  %v555_v28 = vld [vmem:[#allocation6 + $0x220] sm:$0xff] }
  0x83   : > { %639 = vmatpush.msra.mxu1 %v503_v47  ;;  %677 = vmatpush.msra.mxu3 %v537_v0  ;;  %v573_v23 = vld [vmem:[#allocation6 + $0x2b0] sm:$0xff]  ;;  %v572_v26 = vld [vmem:[#allocation6 + $0x2a8] sm:$0xff]  ;;  %v571_v29 = vld [vmem:[#allocation6 + $0x2a0] sm:$0xff] }
  0x84   : > { %684 = vmatpush.msrb.mxu0 %v566_v49  ;;  %658 = vmatpush.msra.mxu2 %v520_v63  ;;  %v737_v24 = vld [vmem:[%s1470_s3 + $0x60] sm:$0xff]  ;;  %v736_v27 = vld [vmem:[%s1470_s3 + $0x58] sm:$0xff]  ;;  %v735_v30 = vld [vmem:[%s1470_s3 + $0x50] sm:$0xff] }
  0x85   : > { %704 = vmatpush.msrb.mxu1 %v582_v50  ;;  %678 = vmatpush.msra.mxu3 %v536_v3  ;;  %v554_v31 = vld [vmem:[#allocation6 + $0x218] sm:$0xff]  ;;  %v553_v34 = vld [vmem:[#allocation6 + $0x210] sm:$0xff]  ;;  %v552_v37 = vld [vmem:[#allocation6 + $0x208] sm:$0xff] }
  0x86   : > { %685 = vmatpush.msrb.mxu0 %v565_v54  ;;  %659 = vmatpush.msra.mxu2 %v519_v2  ;;  %v570_v32 = vld [vmem:[#allocation6 + $0x298] sm:$0xff]  ;;  %v569_v35 = vld [vmem:[#allocation6 + $0x290] sm:$0xff]  ;;  %v568_v38 = vld [vmem:[#allocation6 + $0x288] sm:$0xff] }
  0x87   : > { %705 = vmatpush.msrb.mxu1 %v581_v55  ;;  %660 = vmatmul.f32.vlgmr.msra.gmra.mxu2 %v594_v6  ;;  %v734_v33 = vld [vmem:[%s1470_s3 + $0x48] sm:$0xff]  ;;  %v733_v36 = vld [vmem:[%s1470_s3 + $0x40] sm:$0xff]  ;;  %v551_v39 = vld [vmem:[#allocation6 + $0x200] sm:$0xff] }
  0x88   : > { %686 = vmatpush.msrb.mxu0 %v564_v59  ;;  %679 = vmatpush.msra.mxu3 %v535_v7  ;;  %v567_v40 = vld [vmem:[#allocation6 + $0x280] sm:$0xff]  ;;  %v596_v41 = vld.sshfl [vmem:[#allocation1 + $0x20] sm:$0xff pattern:$0x73625140]  ;;  %v730_v45 = vld [vmem:[%s1470_s3 + $0x28] sm:$0xff] }
  0x89   : > { %706 = vmatpush.msrb.mxu1 %v580_v60  ;;  %620 = vmatmul.f32.vlgmr.msra.gmra.mxu0 %v592_v10  ;;  %v597_v42 = vld.sshfl [vmem:[#allocation1 + $0x28] sm:$0xff pattern:$0x73625140]  ;;  %v732_v43 = vld [vmem:[%s1470_s3 + $0x38] sm:$0xff]  ;;  %v731_v44 = vld [vmem:[%s1470_s3 + $0x30] sm:$0xff] }
  0x8a   : > { %687 = vmatpush.msrb.mxu0 %v563_v62  ;;  %680 = vmatmul.f32.vlgmr.msra.gmra.mxu3 %v595_v11  ;;  %v729_v46 = vld [vmem:[%s1470_s3 + $0x20] sm:$0xff]  ;;  %v728_v47 = vld [vmem:[%s1470_s3 + $0x18] sm:$0xff]  ;;  %v727_v48 = vld [vmem:[%s1470_s3 + $0x10] sm:$0xff] }
  0x8b   : > { %707 = vmatpush.msrb.mxu1 %v579_v1  ;;  %745 = vmatpush.msrb.mxu2 %v740_v15  ;;  %v726_v49 = vld [vmem:[%s1470_s3 + $0x8] sm:$0xff]  ;;  %v725_v50 = vld [vmem:[%s1470_s3] sm:$0xff]  ;;  %v773_v51 = vld [vmem:[%s1472_s5 + $0x38] sm:$0xff] }
  0x8c   : > { %688 = vmatpush.msrb.mxu0 %v562_v4  ;;  %640 = vmatmul.f32.vlgmr.msra.gmra.mxu1 %v593_v14  ;;  %v772_v52 = vld [vmem:[%s1472_s5 + $0x30] sm:$0xff]  ;;  %v771_v53 = vld [vmem:[%s1472_s5 + $0x28] sm:$0xff]  ;;  %v770_v54 = vld [vmem:[%s1472_s5 + $0x20] sm:$0xff] }
  0x8d   : > { %708 = vmatpush.msrb.mxu1 %v578_v5  ;;  %746 = vmatpush.msrb.mxu2 %v739_v18  ;;  %v1019_v55 = vld [vmem:[%s1494_s23] ss:$0 sm:$0xff]  ;;  %v769_v56 = vld [vmem:[%s1472_s5 + $0x18] sm:$0xff]  ;;  %v768_v6 = vld [vmem:[%s1472_s5 + $0x10] sm:$0xff] }
  0x8e   : > { %689 = vmatpush.msrb.mxu0 %v561_v8  ;;  %790 = vmatpush.msrb.mxu3 %v773_v51  ;;  %v767_v7 = vld [vmem:[%s1472_s5 + $0x8] sm:$0xff]  ;;  %v766_v8 = vld [vmem:[%s1472_s5] sm:$0xff] }
  0x8f   : > { %709 = vmatpush.msrb.mxu1 %v577_v9  ;;  %747 = vmatpush.msrb.mxu2 %v738_v21  ;;  %v1020_v9 = vld [vmem:[%s1495_s29] ss:$0 sm:$0xff] }
  0x90   : > { %690 = vmatpush.msrb.mxu0 %v560_v12  ;;  %791 = vmatpush.msrb.mxu3 %v772_v52 }
  0x91   : > { %710 = vmatpush.msrb.mxu1 %v576_v13  ;;  %748 = vmatpush.msrb.mxu2 %v737_v24  ;;  %v1021_v13 = vld [vmem:[%s1496_s11] ss:$0 sm:$0xff] }
  0x92   : > { %691 = vmatpush.msrb.mxu0 %v559_v16  ;;  %792 = vmatpush.msrb.mxu3 %v771_v53 }
  0x93   : > { %711 = vmatpush.msrb.mxu1 %v575_v17  ;;  %749 = vmatpush.msrb.mxu2 %v736_v27 }
  0x94   : > { %692 = vmatpush.msrb.mxu0 %v558_v19  ;;  %793 = vmatpush.msrb.mxu3 %v770_v54 }
  0x95   : > { %712 = vmatpush.msrb.mxu1 %v574_v20  ;;  %750 = vmatpush.msrb.mxu2 %v735_v30 }
  0x96   : > { %693 = vmatpush.msrb.mxu0 %v557_v22  ;;  %794 = vmatpush.msrb.mxu3 %v769_v56 }
  0x97   : > { %713 = vmatpush.msrb.mxu1 %v573_v23  ;;  %751 = vmatpush.msrb.mxu2 %v734_v33 }
  0x98   : > { %694 = vmatpush.msrb.mxu0 %v556_v25  ;;  %795 = vmatpush.msrb.mxu3 %v768_v6 }
  0x99   : > { %714 = vmatpush.msrb.mxu1 %v572_v26  ;;  %752 = vmatpush.msrb.mxu2 %v733_v36 }
  0x9a   : > { %695 = vmatpush.msrb.mxu0 %v555_v28  ;;  %796 = vmatpush.msrb.mxu3 %v767_v7 }
  0x9b   : > { %715 = vmatpush.msrb.mxu1 %v571_v29  ;;  %753 = vmatpush.msrb.mxu2 %v732_v43 }
  0x9c   : > { %696 = vmatpush.msrb.mxu0 %v554_v31  ;;  %797 = vmatpush.msrb.mxu3 %v766_v8 }
  0x9d   : > { %716 = vmatpush.msrb.mxu1 %v570_v32  ;;  %754 = vmatpush.msrb.mxu2 %v731_v44 }
  0x9e   : > { %697 = vmatpush.msrb.mxu0 %v553_v34 }
  0x9f   : > { %717 = vmatpush.msrb.mxu1 %v569_v35  ;;  %755 = vmatpush.msrb.mxu2 %v730_v45 }
  0xa0   : > { %698 = vmatpush.msrb.mxu0 %v552_v37 }
  0xa1   : > { %718 = vmatpush.msrb.mxu1 %v568_v38  ;;  %756 = vmatpush.msrb.mxu2 %v729_v46 }
  0xa2   : > { %699 = vmatpush.msrb.mxu0 %v551_v39 }
  0xa3   : > { %719 = vmatpush.msrb.mxu1 %v567_v40  ;;  %700 = vmatmul.f32.vlgmr.msrb.gmra.mxu0 %v596_v41 }
  0xa4   : > { %720 = vmatmul.f32.vlgmr.msrb.gmra.mxu1 %v597_v42  ;;  %757 = vmatpush.msrb.mxu2 %v728_v47 }
  0xa6   : > { %758 = vmatpush.msrb.mxu2 %v727_v48 }
  0xa8   : > { %759 = vmatpush.msrb.mxu2 %v726_v49 }
  0xaa   : > { %760 = vmatpush.msrb.mxu2 %v725_v50 }
 0x106   : > { %v621_v57 = vpop.f32.mrf.mxu0 }
 0x107   : > { %v622_v58 = vadd.f32 %v1019_v55, %v621_v57 }
 0x109   : > { %v641_v59 = vpop.f32.mrf.mxu1 }
 0x10a   : > { %v642_v60 = vadd.f32 %v641_v59, %v622_v58  ;;  %v661_v61 = vpop.f32.mrf.mxu2 }
 0x10c   : > { %v662_v62 = vadd.f32 %v661_v61, %v642_v60 }
 0x10d   : > { %v681_v63 = vpop.f32.mrf.mxu3 }
 0x10e   : > { %v682_v0 = vadd.f32 %v681_v63, %v662_v62 }
 0x120   : > { %v701_v1 = vpop.f32.mrf.mxu0 }
 0x121   : > { %v721_v2 = vpop.f32.mrf.mxu1  ;;  %v702_v3 = vadd.f32 %v701_v1, %v682_v0 }
 0x123   : > { %v722_v4 = vadd.f32 %v721_v2, %v702_v3 }
 0x125   : > { %v724_v5 = vmax.f32 %v722_v4, 0.0 }
 0x127   : > { %761 = vmatmul.f32.vlgmr.msrb.gmra.mxu2 %v724_v5 }
 0x1aa   : > { %v762_v10 = vpop.f32.mrf.mxu2 }
 0x1ab   : > { %v763_v11 = vadd.f32 %v1020_v9, %v762_v10 }
 0x1ad   : > { %v765_v12 = vmax.f32 %v763_v11, 0.0 }
 0x1af   : > { %914 = vmatmul.msk.f32.vlgmr.msrb.gmra.mxu3 %vm778_vm7, %v765_v12 }
 0x232   : > { %v799_v14 = vpop.f32.mrf.mxu3 }
 0x233   : > { %v800_v15 = vadd.f32 %v1021_v13, %v799_v14 }
 0x235   : > { %v915_v16 = vmul.f32 -1.442695, %v800_v15 }
 0x237   : > { %1022 = vpow2.f32 %v915_v16 }
 0x23d   : > { %v1023_v17 = vpop.eup %1022 }
 0x23e   : > { %v805_v18 = vadd.f32 1.0, %v1023_v17 }
 0x240   : > { %1024 = vrcp.f32 %v805_v18  ;;  %v817_v22 = vand.u32 2147483648, %v805_v18  ;;  %v815_v24 = vand.u32 2147483647, %v805_v18  ;;  %vm811_vm9 = vweird.f32 %v805_v18 }
 0x242   : > { %v818_v26 = vor.u32 1.1754944e-38, %v817_v22  ;;  %vm816_vm12 = vcmp.eq.f32.partialorder %v815_v24, 8.507059e+37 }
 0x246   : > { %v1025_v19 = vpop.eup %1024 }
 0x247   : > { %v807_v20 = vmul.f32 %v1025_v19, %v805_v18  ;;  %vm812_vm8 = vweird.f32 %v1025_v19 }
 0x248   : > { %vm813_vm10 = vmor %vm811_vm9, %vm812_vm8 }
 0x249   : > { %v808_v21 = vsub.f32 1.0, %v807_v20 }
 0x24b   : > { %v809_v23 = vmul.f32 %v1025_v19, %v808_v21 }
 0x24d   : > { %v810_v25 = vadd.f32 %v1025_v19, %v809_v23 }
 0x24f   : > { %v814_v27 = vsel %vm813_vm10, %v1025_v19, %v810_v25 }
 0x250   : > { %v819_v28 = vsel %vm816_vm12, %v818_v26, %v814_v27 }
 0x251   : > { %822 = vst.msk [vmem:[#allocation8] sm:$0x3] %vm821_vm11, %v819_v28 }
 0x252 PF: > { %s1497_s15 = sld [smem:[#allocation13_spill]]  ;;  %s1197_s17 = smov [#allocation8]  }
 0x253   : > { %s1499_s14 = sld [smem:[#allocation20_spill]]  ;;  %s829_s18 = sshll.u32 %s1197_s17, 4  ;;  %s830_s18 = int_to_ptr.vmem [resolvable:$true] %s829_s18 }
 0x258   : > { %s1498_s20 = sadd.s32 4294967295, %s1497_s15  }
 0x259   : > { %p945_p8 = scmp.eq.s32.totalorder %s1498_s20, 7  ;;  %s831_s16 = sshll.u32 %s1499_s14, 4  ;;  %s832_s16 = int_to_ptr.hbm [resolvable:$true] %s831_s16 }
 0x25b   : > { %931 = dma.vmem_to_hbm [thread:$0]  (%p945_p8), %s830_s18, 32, %s832_s16, [#allocation5]  }
 0x25c   : > { %1155 = dma.done.wait (%p945_p8), [#allocation5], 32  }
 0x25d   : > { %1157 = vsyncadd (%p945_p8), [#allocation5], 4294967264 }
 0x25e PF: > { %s1500_s19 = sld [smem:[#allocation13_spill]]  ;;  %s1504_s24 = smov %s1164_s25 }
 0x25f   : > { %s1501_s27 = sld [smem:[#allocation12_spill]]  ;;  %s1505_s25 = smov %s1168_s26 }
 0x260   : > { %s1502_s29 = sld [smem:[#allocation14_spill]]  ;;  %s1506_s26 = smov %s1323_s9 }
 0x261   : > { %s1503_s23 = sld [smem:[#allocation15_spill]]  ;;  %s1507_s28 = smov %s1184_s30 }
 0x264   : > { %s22_s8 = sadd.s32 1, %s1500_s19  }
 0x265   : > { %p19_p9 = scmp.ge.s32.totalorder %s22_s8, 10  }
 0x267   : > { %s1508_s30 = smov %s1503_s23  ;;  %21 = sbr.rel (!%p19_p9) target bundleno = 13 (0xd), region = 98 }
 0x26c   :  { %845 = vsyncpa [#allocation4], 1 }
 0x26d   :  { %847 = vsyncpa [#allocation4 + $0x1], 1 }
 0x26e   :  { %848 = vsyncpa [#allocation7], 1 }
 0x26f   :  { %849 = vsyncpa [#allocation5], 1 }
 0x270   :  { %851 = vsyncpa [#allocation5 + $0x1], 1 }

</bundles_post_ra>
